<compile_context>
chip_gen: v7x
topology: tpu7x:2x2x1
jax: 0.10.0
libtpu: 0.0.40
codegen_flags: <defaults>
</compile_context>

<pallas_src>
import functools
import math

import jax
import jax.numpy as jnp
from jax.experimental import pallas as pl
from jax.experimental.pallas import tpu as pltpu

_LANE = 128
_SUBLANE = 8


def _round_up(v, m):
    return (v + m - 1) // m * m


def _pad_dim(d):
    return _round_up(max(int(d), 1), _LANE)


# --------------------------------------------------------------------------- kernel


def _make_kernel(n_layers, activation_type, is_dense):
    if activation_type == "relu":
        act = lambda h: jnp.maximum(h, 0.0)
    elif activation_type == "tanh":
        act = jnp.tanh
    else:
        raise ValueError(activation_type)

    def kernel(k_ids_ref, x_ref, *refs):
        del k_ids_ref  # consumed only by the BlockSpec index_maps
        o_ref = refs[-1]
        p_refs = refs[:-1]

        # acts[j] holds the j-th lane-padded input piece: x, act(y_0), act(y_1), ...
        acts = [x_ref[...]]
        idx = 0
        for i in range(n_layers):
            # FeedForward: only the previous activation feeds layer i.
            # Dense: every previous piece feeds layer i (split-matmul form of concat).
            inputs = acts if is_dense else [acts[-1]]
            y = None
            for a in inputs:
                w = p_refs[idx][...]          # (d_piece_pad, d_out_pad)
                idx += 1
                contrib = jnp.dot(a.astype(w.dtype), w,
                                  preferred_element_type=jnp.float32)
                y = contrib if y is None else y + contrib
            b = p_refs[idx][...]              # (1, d_out_pad) f32, broadcasts over rows
            idx += 1
            y = y + b
            if i != n_layers - 1:
                acts.append(act(y))           # activations kept in f32
            else:
                o_ref[...] = y.astype(o_ref.dtype)

    return kernel


# ------------------------------------------------------------------- parameter prep


def init_sequential_params(key, N, d_layers, is_dense=False):
    """Deterministic init mimicking nn.Linear's uniform(-1/sqrt(fan_in), 1/sqrt(fan_in)).
    Weights stored transposed vs. PyTorch: W_i is (N, d_in_i, d_out_i), b_i is (N, 1, d_out_i)."""
    n_layers = len(d_layers) - 1
    params = []
    for i in range(n_layers):
        d_in = int(sum(d_layers[: i + 1])) if is_dense else d_layers[i]
        d_out = d_layers[i + 1]
        key, kw, kb = jax.random.split(key, 3)
        bound = 1.0 / (d_in ** 0.5)
        W = jax.random.uniform(kw, (N, d_in, d_out), jnp.float32, -bound, bound)
        b = jax.random.uniform(kb, (N, 1, d_out), jnp.float32, -bound, bound)
        params.append((W, b))
    return params


def prepare_padded_params(params, d_layers, is_dense=False, weight_dtype=jnp.float32):
    """Split DenseNN weights per concatenated input piece and zero-pad everything to
    lane-aligned (multiple-of-128) feature widths.  Returns a flat tuple:
      layer0: chunk0[, chunk1, ...], bias0, layer1: ..., ...
    chunk: (N, pad(d_piece), pad(d_out_i)), bias: (N, 1, pad(d_out_i))."""
    n_layers = len(d_layers) - 1
    flat = []
    for i in range(n_layers):
        W, b = params[i]
        N = W.shape[0]
        d_out = d_layers[i + 1]
        d_out_pad = _pad_dim(d_out)
        piece_widths = list(d_layers[: i + 1]) if is_dense else [d_layers[i]]
        off = 0
        for w_d in piece_widths:
            chunk = W[:, off: off + w_d, :]
            off += w_d
            chunk = jnp.pad(chunk, ((0, 0), (0, _pad_dim(w_d) - w_d),
                                    (0, d_out_pad - d_out)))
            flat.append(chunk.astype(weight_dtype))
        b2 = jnp.pad(b.reshape(N, 1, d_out),
                     ((0, 0), (0, 0), (0, d_out_pad - d_out)))
        flat.append(b2.astype(jnp.float32))
    return tuple(flat)


# ------------------------------------------------------------------------- forward


@functools.partial(
    jax.jit,
    static_argnames=("d_layers", "activation_type", "is_dense", "batch_tile"))
def sequential_nn_forward_multi(k_ids, x, flat_padded_params, d_layers,
                                activation_type="relu", is_dense=False,
                                batch_tile=512):
    """Run sub-models k_ids[0..n_k-1] on x in ONE pallas_call.
    Returns (n_k, B, d_out)."""
    d_layers = tuple(int(d) for d in d_layers)
    n_layers = len(d_layers) - 1
    n_k = k_ids.shape[0]
    B, d_in = x.shape
    assert d_in == d_layers[0]
    d_out = d_layers[-1]
    d_in_pad = _pad_dim(d_in)
    d_out_pad = _pad_dim(d_out)

    # Batch tiling: batch rows on sublanes, lane-dense feature dims.
    TB = batch_tile if B > batch_tile else _round_up(B, _SUBLANE)
    B_pad = _round_up(B, TB)
    n_b = B_pad // TB

    x_pad = jnp.pad(x.astype(jnp.float32),
                    ((0, B_pad - B), (0, d_in_pad - d_in)))

    # x tiles over batch; all weights/biases indexed by the prefetched model id so
    # they stay VMEM-resident across the (inner) batch axis.
    in_specs = [pl.BlockSpec((TB, d_in_pad), lambda ki, bi, kref: (bi, 0))]
    p_idx = 0
    for i in range(n_layers):
        n_chunks = (i + 1) if is_dense else 1
        for _ in range(n_chunks):
            Wp = flat_padded_params[p_idx]
            p_idx += 1
            in_specs.append(pl.BlockSpec(
                (None,) + tuple(Wp.shape[1:]),
                lambda ki, bi, kref: (kref[ki], 0, 0)))
        bp = flat_padded_params[p_idx]
        p_idx += 1
        in_specs.append(pl.BlockSpec(
            (None, 1, bp.shape[-1]),
            lambda ki, bi, kref: (kref[ki], 0, 0)))
    assert p_idx == len(flat_padded_params)

    out_spec = pl.BlockSpec((None, TB, d_out_pad),
                            lambda ki, bi, kref: (ki, bi, 0))

    # Explicit VMEM budget: resident (double-buffered) weights + activations + IO tiles.
    param_bytes = sum(math.prod(p.shape[1:]) * p.dtype.itemsize
                      for p in flat_padded_params)
    act_bytes = 4 * TB * sum(_pad_dim(d) for d in d_layers)
    io_bytes = 4 * 2 * TB * (d_in_pad + d_out_pad)
    vmem_est = 2 * param_bytes + 2 * act_bytes + io_bytes
    vmem_limit = int(min(max(2 * vmem_est, 32 * 1024 * 1024), 56 * 1024 * 1024))
    # TODO(synk): for very wide d_layers that exceed v7x's 64 MiB VMEM, split the
    # largest layer's contracting dim over a reduction grid axis (pl.when init/finalize)
    # or prepare weights in bf16 via prepare_padded_params(weight_dtype=jnp.bfloat16).

    kernel = _make_kernel(n_layers, activation_type, is_dense)

    out = pl.pallas_call(
        kernel,
        out_shape=jax.ShapeDtypeStruct((n_k, B_pad, d_out_pad), jnp.float32),
        grid_spec=pltpu.PrefetchScalarGridSpec(
            num_scalar_prefetch=1,
            grid=(n_k, n_b),
            in_specs=in_specs,
            out_specs=out_spec,
        ),
        compiler_params=pltpu.CompilerParams(
            dimension_semantics=("parallel", "parallel"),
            vmem_limit_bytes=vmem_limit,
        ),
    )(k_ids.astype(jnp.int32), x_pad, *flat_padded_params)

    return out[:, :B, :d_out]


def sequential_nn_forward(k, x, flat_padded_params, d_layers,
                          activation_type="relu", is_dense=False, batch_tile=512):
    """SequentialNN.forward(k, x): run sub-model k on x. Returns (B, d_out)."""
    k_ids = jnp.atleast_1d(jnp.asarray(k, dtype=jnp.int32))
    return sequential_nn_forward_multi(
        k_ids, x, flat_padded_params,
        d_layers=tuple(d_layers), activation_type=activation_type,
        is_dense=is_dense, batch_tile=batch_tile)[0]


# ----------------------------------------------------------------------- reference


def reference_forward(k, x, params, activation_type="relu", is_dense=False):
    """Plain-JAX reference matching SequentialNN(k, x) semantics."""
    act = (lambda h: jnp.maximum(h, 0.0)) if activation_type == "relu" else jnp.tanh
    n_layers = len(params)
    for i, (W, b) in enumerate(params):
        y = x @ W[k] + b[k]          # b[k] has shape (1, d_out) -> broadcasts
        if i != n_layers - 1:
            x = jnp.concatenate([x, act(y)], axis=-1) if is_dense else act(y)
        else:
            x = y
    return x


# ----------------------------------------------------------------------------- main


if __name__ == "__main__":
    key = jax.random.PRNGKey(0)
    B = 8
    ok = True

    configs = [
        # SequentialNN default: FeedForwardNN sub-models, relu.
        dict(N=3, d_layers=(4, 32, 16, 2), activation_type="relu", is_dense=False),
        # DenseNN sub-models, tanh (exercises the split-matmul concat path).
        dict(N=2, d_layers=(4, 32, 16, 2), activation_type="tanh", is_dense=True),
    ]

    for cfg in configs:
        key, kx, kp = jax.random.split(key, 3)
        x = jax.random.normal(kx, (B, cfg["d_layers"][0]), dtype=jnp.float32)
        params = init_sequential_params(kp, cfg["N"], list(cfg["d_layers"]),
                                        is_dense=cfg["is_dense"])
        padded = prepare_padded_params(params, cfg["d_layers"],
                                       is_dense=cfg["is_dense"])

        # All N sub-models evaluated in a single pallas_call (amortized dispatch,
        # weight DMA for model k+1 pipelines behind compute of model k).
        k_ids = jnp.arange(cfg["N"], dtype=jnp.int32)
        outs = sequential_nn_forward_multi(
            k_ids, x, padded, d_layers=cfg["d_layers"],
            activation_type=cfg["activation_type"], is_dense=cfg["is_dense"])
        outs = jax.block_until_ready(outs)
        for k in range(cfg["N"]):
            ref = reference_forward(k, x, params, cfg["activation_type"],
                                    cfg["is_dense"])
            ok = ok and bool(jnp.allclose(outs[k], ref, atol=2e-5, rtol=2e-5))

        # Single-k entry point (matches SequentialNN.forward(k, x) signature).
        k0 = cfg["N"] - 1
        out0 = jax.block_until_ready(
            sequential_nn_forward(k0, x, padded, cfg["d_layers"],
                                  cfg["activation_type"], cfg["is_dense"]))
        ref0 = reference_forward(k0, x, params, cfg["activation_type"],
                                 cfg["is_dense"])
        ok = ok and bool(jnp.allclose(out0, ref0, atol=2e-5, rtol=2e-5))

    print("KERNEL_OK" if ok else "KERNEL_MISMATCH")
</pallas_src>

<mosaic_0001>
module attributes {stable_mosaic.version = 11 : i64} {
  func.func @kernel(%arg0: i32, %arg1: i32, %arg2: memref<3xi32, #tpu.memory_space<smem>>, %arg3: memref<8x128xf32, #tpu.memory_space<vmem>>, %arg4: memref<1x128x128xf32, #tpu.memory_space<vmem>>, %arg5: memref<1x1x128xf32, #tpu.memory_space<vmem>>, %arg6: memref<1x128x128xf32, #tpu.memory_space<vmem>>, %arg7: memref<1x1x128xf32, #tpu.memory_space<vmem>>, %arg8: memref<1x128x128xf32, #tpu.memory_space<vmem>>, %arg9: memref<1x1x128xf32, #tpu.memory_space<vmem>>, %arg10: memref<1x8x128xf32, #tpu.memory_space<vmem>>) attributes {dimension_semantics = [#tpu.dimension_semantics<parallel>, #tpu.dimension_semantics<parallel>], iteration_bounds = array<i64: 3, 1>, scalar_prefetch = 1 : i64, scratch_operands = 0 : i64, tpu.core_type = #tpu.core_type<tc>, window_params = [{transform_indices = @transform_0, window_bounds = array<i64: 8, 128>}, {transform_indices = @transform_1, window_bounds = array<i64: 1, 128, 128>}, {transform_indices = @transform_2, window_bounds = array<i64: 1, 1, 128>}, {transform_indices = @transform_3, window_bounds = array<i64: 1, 128, 128>}, {transform_indices = @transform_4, window_bounds = array<i64: 1, 1, 128>}, {transform_indices = @transform_5, window_bounds = array<i64: 1, 128, 128>}, {transform_indices = @transform_6, window_bounds = array<i64: 1, 1, 128>}, {transform_indices = @transform_7, window_bounds = array<i64: 1, 8, 128>}]} {
    %c0 = arith.constant 0 : index
    %c0_0 = arith.constant 0 : index
    %0 = vector.load %arg3[%c0, %c0_0] : memref<8x128xf32, #tpu.memory_space<vmem>>, vector<8x128xf32>
    %c0_1 = arith.constant 0 : index
    %c0_2 = arith.constant 0 : index
    %c0_3 = arith.constant 0 : index
    %1 = vector.load %arg4[%c0_1, %c0_2, %c0_3] : memref<1x128x128xf32, #tpu.memory_space<vmem>>, vector<1x128x128xf32>
    %2 = vector.shape_cast %1 : vector<1x128x128xf32> to vector<128x128xf32>
    %cst = arith.constant dense<0.000000e+00> : vector<8x128xf32>
    %3 = tpu.matmul %0, %2, %cst {dimension_numbers = #tpu.dot_dimension_numbers<[1], [0], [0], [1], [0, 0, 1, 1], [], []>} : vector<8x128xf32>, vector<128x128xf32>, vector<8x128xf32> -> vector<8x128xf32>
    %c0_4 = arith.constant 0 : index
    %c0_5 = arith.constant 0 : index
    %c0_6 = arith.constant 0 : index
    %4 = vector.load %arg5[%c0_4, %c0_5, %c0_6] : memref<1x1x128xf32, #tpu.memory_space<vmem>>, vector<1x1x128xf32>
    %5 = vector.shape_cast %4 : vector<1x1x128xf32> to vector<1x128xf32>
    %6 = vector.broadcast %5 : vector<1x128xf32> to vector<8x128xf32>
    %7 = arith.addf %3, %6 : vector<8x128xf32>
    %cst_7 = arith.constant 0.000000e+00 : f32
    %8 = vector.broadcast %cst_7 : f32 to vector<8x128xf32>
    %9 = arith.maximumf %7, %8 : vector<8x128xf32>
    %c0_8 = arith.constant 0 : index
    %c0_9 = arith.constant 0 : index
    %c0_10 = arith.constant 0 : index
    %10 = vector.load %arg6[%c0_8, %c0_9, %c0_10] : memref<1x128x128xf32, #tpu.memory_space<vmem>>, vector<1x128x128xf32>
    %11 = vector.shape_cast %10 : vector<1x128x128xf32> to vector<128x128xf32>
    %cst_11 = arith.constant dense<0.000000e+00> : vector<8x128xf32>
    %12 = tpu.matmul %9, %11, %cst_11 {dimension_numbers = #tpu.dot_dimension_numbers<[1], [0], [0], [1], [0, 0, 1, 1], [], []>} : vector<8x128xf32>, vector<128x128xf32>, vector<8x128xf32> -> vector<8x128xf32>
    %c0_12 = arith.constant 0 : index
    %c0_13 = arith.constant 0 : index
    %c0_14 = arith.constant 0 : index
    %13 = vector.load %arg7[%c0_12, %c0_13, %c0_14] : memref<1x1x128xf32, #tpu.memory_space<vmem>>, vector<1x1x128xf32>
    %14 = vector.shape_cast %13 : vector<1x1x128xf32> to vector<1x128xf32>
    %15 = vector.broadcast %14 : vector<1x128xf32> to vector<8x128xf32>
    %16 = arith.addf %12, %15 : vector<8x128xf32>
    %cst_15 = arith.constant 0.000000e+00 : f32
    %17 = vector.broadcast %cst_15 : f32 to vector<8x128xf32>
    %18 = arith.maximumf %16, %17 : vector<8x128xf32>
    %c0_16 = arith.constant 0 : index
    %c0_17 = arith.constant 0 : index
    %c0_18 = arith.constant 0 : index
    %19 = vector.load %arg8[%c0_16, %c0_17, %c0_18] : memref<1x128x128xf32, #tpu.memory_space<vmem>>, vector<1x128x128xf32>
    %20 = vector.shape_cast %19 : vector<1x128x128xf32> to vector<128x128xf32>
    %cst_19 = arith.constant dense<0.000000e+00> : vector<8x128xf32>
    %21 = tpu.matmul %18, %20, %cst_19 {dimension_numbers = #tpu.dot_dimension_numbers<[1], [0], [0], [1], [0, 0, 1, 1], [], []>} : vector<8x128xf32>, vector<128x128xf32>, vector<8x128xf32> -> vector<8x128xf32>
    %c0_20 = arith.constant 0 : index
    %c0_21 = arith.constant 0 : index
    %c0_22 = arith.constant 0 : index
    %22 = vector.load %arg9[%c0_20, %c0_21, %c0_22] : memref<1x1x128xf32, #tpu.memory_space<vmem>>, vector<1x1x128xf32>
    %23 = vector.shape_cast %22 : vector<1x1x128xf32> to vector<1x128xf32>
    %24 = vector.broadcast %23 : vector<1x128xf32> to vector<8x128xf32>
    %25 = arith.addf %21, %24 : vector<8x128xf32>
    %c0_23 = arith.constant 0 : index
    %c0_24 = arith.constant 0 : index
    %c0_25 = arith.constant 0 : index
    %26 = vector.load %arg10[%c0_23, %c0_24, %c0_25] : memref<1x8x128xf32, #tpu.memory_space<vmem>>, vector<1x8x128xf32>
    %27 = vector.shape_cast %26 : vector<1x8x128xf32> to vector<8x128xf32>
    %28 = vector.shape_cast %25 : vector<8x128xf32> to vector<1x8x128xf32>
    tpu.vector_store %arg10[%c0_23, %c0_24, %c0_25], %28 {strides = array<i32>} : memref<1x8x128xf32, #tpu.memory_space<vmem>>, vector<1x8x128xf32>,
    return
  }
  func.func @transform_0(%arg0: i32, %arg1: i32, %arg2: memref<3xi32, #tpu.memory_space<smem>>) -> (i32, i32) {
    %c0_i32 = arith.constant 0 : i32
    %c0_i32_0 = arith.constant 0 : i32
    return %arg1, %c0_i32 : i32, i32
  }
  func.func @transform_1(%arg0: i32, %arg1: i32, %arg2: memref<3xi32, #tpu.memory_space<smem>>) -> (i32, i32, i32) {
    %0 = arith.index_cast %arg0 : i32 to index
    %1 = memref.load %arg2[%0] : memref<3xi32, #tpu.memory_space<smem>>
    %c0_i32 = arith.constant 0 : i32
    %c0_i32_0 = arith.constant 0 : i32
    %c0_i32_1 = arith.constant 0 : i32
    return %1, %c0_i32, %c0_i32_0 : i32, i32, i32
  }
  func.func @transform_2(%arg0: i32, %arg1: i32, %arg2: memref<3xi32, #tpu.memory_space<smem>>) -> (i32, i32, i32) {
    %0 = arith.index_cast %arg0 : i32 to index
    %1 = memref.load %arg2[%0] : memref<3xi32, #tpu.memory_space<smem>>
    %c0_i32 = arith.constant 0 : i32
    %c0_i32_0 = arith.constant 0 : i32
    %c0_i32_1 = arith.constant 0 : i32
    return %1, %c0_i32, %c0_i32_0 : i32, i32, i32
  }
  func.func @transform_3(%arg0: i32, %arg1: i32, %arg2: memref<3xi32, #tpu.memory_space<smem>>) -> (i32, i32, i32) {
    %0 = arith.index_cast %arg0 : i32 to index
    %1 = memref.load %arg2[%0] : memref<3xi32, #tpu.memory_space<smem>>
    %c0_i32 = arith.constant 0 : i32
    %c0_i32_0 = arith.constant 0 : i32
    %c0_i32_1 = arith.constant 0 : i32
    return %1, %c0_i32, %c0_i32_0 : i32, i32, i32
  }
  func.func @transform_4(%arg0: i32, %arg1: i32, %arg2: memref<3xi32, #tpu.memory_space<smem>>) -> (i32, i32, i32) {
    %0 = arith.index_cast %arg0 : i32 to index
    %1 = memref.load %arg2[%0] : memref<3xi32, #tpu.memory_space<smem>>
    %c0_i32 = arith.constant 0 : i32
    %c0_i32_0 = arith.constant 0 : i32
    %c0_i32_1 = arith.constant 0 : i32
    return %1, %c0_i32, %c0_i32_0 : i32, i32, i32
  }
  func.func @transform_5(%arg0: i32, %arg1: i32, %arg2: memref<3xi32, #tpu.memory_space<smem>>) -> (i32, i32, i32) {
    %0 = arith.index_cast %arg0 : i32 to index
    %1 = memref.load %arg2[%0] : memref<3xi32, #tpu.memory_space<smem>>
    %c0_i32 = arith.constant 0 : i32
    %c0_i32_0 = arith.constant 0 : i32
    %c0_i32_1 = arith.constant 0 : i32
    return %1, %c0_i32, %c0_i32_0 : i32, i32, i32
  }
  func.func @transform_6(%arg0: i32, %arg1: i32, %arg2: memref<3xi32, #tpu.memory_space<smem>>) -> (i32, i32, i32) {
    %0 = arith.index_cast %arg0 : i32 to index
    %1 = memref.load %arg2[%0] : memref<3xi32, #tpu.memory_space<smem>>
    %c0_i32 = arith.constant 0 : i32
    %c0_i32_0 = arith.constant 0 : i32
    %c0_i32_1 = arith.constant 0 : i32
    return %1, %c0_i32, %c0_i32_0 : i32, i32, i32
  }
  func.func @transform_7(%arg0: i32, %arg1: i32, %arg2: memref<3xi32, #tpu.memory_space<smem>>) -> (i32, i32, i32) {
    %c0_i32 = arith.constant 0 : i32
    %c0_i32_0 = arith.constant 0 : i32
    return %arg0, %arg1, %c0_i32 : i32, i32, i32
  }
}

</mosaic_0001>

<bundles_post_ra>
// kernel: sequential_nn_forward_multi.1
= control target key start
LH: loop header
LB: loop body
LE: loop exit
PB: predicated region body
PF: predicated region fallthrough
CT: control target
= control target key end

     0   :  { %s2067_s0 = inlined_call_operand.vmem [shape: s32[3], index: 0, kind: input, shape index: {}]   ;;  %s2068_s1 = inlined_call_operand.vmem [shape: f32[8,128], index: 1, kind: input, shape index: {}]   ;;  %s2069_s2 = inlined_call_operand.hbm [shape: f32[3,128,128], index: 2, kind: input, shape index: {}]   ;;  %s2070_s3 = inlined_call_operand.vmem [shape: f32[3,1,128], index: 3, kind: input, shape index: {}]   ;;  %s2071_s4 = inlined_call_operand.hbm [shape: f32[3,128,128], index: 4, kind: input, shape index: {}]   ;;  %s2072_s5 = inlined_call_operand.vmem [shape: f32[3,1,128], index: 5, kind: input, shape index: {}]   ;;  %s2073_s6 = inlined_call_operand.hbm [shape: f32[3,128,128], index: 6, kind: input, shape index: {}]   ;;  %s2074_s7 = inlined_call_operand.vmem [shape: f32[3,1,128], index: 7, kind: input, shape index: {}]   ;;  %s2075_s8 = inlined_call_operand.vmem [shape: f32[3,8,128], index: 8, kind: output, shape index: {}]  }
   0x1   :  { %2088 = sst [smem:[#allocation23_spill]] %s2069_s2  ;;  %s13_s29 = sshll.u32 %s2067_s0, 4  ;;  %s14_s29 = int_to_ptr.vmem [resolvable:$true] %s13_s29 }
   0x2   :  { %2089 = sst [smem:[#allocation24_spill]] %s2070_s3  ;;  %s1330_s30 = scalar_lea.vmem %s14_s29, 16 }
   0x3   :  { %2090 = sst [smem:[#allocation25_spill]] %s2071_s4  ;;  %p1331_p0 = scmp.ne.s32.totalorder %s14_s29, %s1330_s30 }
   0x4   :  { %2091 = sst [smem:[#allocation26_spill]] %s2072_s5  ;;  %p1335_p1 = scmp.lt.s32.totalorder %s14_s29, %s14_s29 }
   0x5   :  { %2092 = sst [smem:[#allocation27_spill]] %s2074_s7  ;;  %p1336_p2 = scmp.lt.s32.totalorder %s1330_s30, %s1330_s30 }
   0x6   :  { %2093 = sst [smem:[#allocation28_spill]] %s2075_s8 }
   0x7   :  { %p1337_p3 = por %p1336_p2, %p1335_p1 }
   0x9   :  { %p1338_p4 = pnand %p1337_p3, %p1331_p0 }
   0xb   :  { %1341 = shalt.err (!%p1338_p4)  }
   0xc   :  { %s1542_s9 = smov [#allocation3]  }
   0xd   :  { %16 = dma.vmem_to_smem %s14_s29, 16, %s1542_s9, [#allocation2] }
   0xe   :  { %1480 = dma.done.wait [#allocation2], 16 }
   0xf   :  { %1481 = vsyncadd [#allocation2], 4294967280 }
  0x10   :  { %18 = sfence }
  0x11   :  { %19 = vsyncpa [#allocation5], 0 }
  0x12   :  { %21 = vsyncpa [#allocation5 + $0x1], 0 }
  0x13   :  { %22 = vsyncpa [#allocation7], 0 }
  0x14   :  { %24 = vsyncpa [#allocation7 + $0x1], 0  ;;  %s1599_s10 = smov 0   ;;  %s1601_s0 = smov 0  }
  0x15   :  { %s1603_s11 = smov 0   ;;  %s1605_s12 = smov 0  }
  0x16   :  { %s1607_s13 = smov 0   ;;  %s1609_s14 = smov 0  }
  0x17   :  { %s1611_s15 = smov 0   ;;  %s1613_s16 = smov 0  }
  0x18   :  { %s1615_s17 = smov 0   ;;  %s1617_s18 = smov 0  }
  0x19   :  { %s1619_s19 = smov 0   ;;  %s1621_s20 = smov 0  }
  0x1a LB: > { %2094 = sst [smem:[#allocation19_spill]] %s1516_s14  ;;  %s2076_s21 = sadd.s32 4294967295, %s1540_s20   ;;  %s1540_s20 = sphi %s1621_s20, %s30_s20   ;;  %s1536_s19 = sphi %s1619_s19, %s2143_s19   ;;  %s1532_s18 = sphi %s1617_s18, %s2142_s18   ;;  %s1528_s17 = sphi %s1615_s17, %s2141_s17   ;;  %s1524_s16 = sphi %s1613_s16, %s2140_s16   ;;  %s1520_s15 = sphi %s1611_s15, %s2139_s15   ;;  %s1516_s14 = sphi %s1609_s14, %s2138_s14   ;;  %s1512_s13 = sphi %s1607_s13, %s2137_s13   ;;  %s1508_s12 = sphi %s1605_s12, %s2136_s12   ;;  %s1504_s11 = sphi %s1603_s11, %s2135_s11   ;;  %s1500_s0 = sphi %s1601_s0, %s2134_s0   ;;  %s1496_s10 = sphi %s1599_s10, %s2133_s10  }
  0x1b   : > { %2095 = sst [smem:[#allocation20_spill]] %s1528_s17  ;;  %s42_s22 = sadd.s32 1, %s1536_s19 }
  0x1c   : > { %p44_p5 = scmp.ge.s32.totalorder %s42_s22, 3  ;;  %p2078_p6 = scmp.eq.s32.totalorder %s1540_s20, 0 }
  0x1d   : > { %p1662_p7 = scmp.eq.s32.totalorder %s2076_s21, 0  ;;  %s128_s24 = sld [smem:[#allocation3 + %s1536_s19]] }
  0x1e   : > { %s2145_s22 = smov (%p44_p5, %s42_s22), 0  ;;  %s133_s25 = sadd.s32 1, %s1516_s14 }
  0x1f   : > { %p140_p8 = scmp.ne.s32.totalorder %s1516_s14, %s1512_s13  ;;  %s129_s26 = sld [smem:[#allocation3 + %s2145_s22]] }
  0x20   : > { %p146_p9 = scmp.ne.s32.totalorder %s1512_s13, %s1508_s12  ;;  %p2077_p12 = scmp.lt.s32.totalorder %s1540_s20, 3 }
  0x21   : > { %p1676_p10 = por %p140_p8, %p2078_p6  ;;  %s319_s29 = sand.u32 1, %s1540_s20  }
  0x22   : > { %p1682_p11 = por %p146_p9, %p1662_p7  ;;  %s321_s30 = sand.u32 1, %s1516_s14  }
  0x23   : > { %s952_s9 = sshll.u32 %s321_s30, 7  ;;  %p1707_p0 = pnand %p2077_p12, %p1676_p10 }
  0x24   : > { %s2098_s28 = scalar_select %p1682_p11, 1, 0 }
  0x25   : > { %s130_s12 = ssub.s32 %s128_s24, %s129_s26  ;;  %s323_s21 = scalar_lea.vmem [#allocation6], %s952_s9 }
  0x26   : > { %p131_p13 = scmp.eq.s32.totalorder %s130_s12, 0  ;;  %s331_s8 = sshll.u32 %s323_s21, 4  ;;  %s1701_s8 = int_to_ptr.vmem [resolvable:$true] %s331_s8 }
  0x27   : > { %s1202_s7 = scalar_select %p1676_p10, [#allocation3], [#allocation10] }
  0x28   : > { %s1692_s5 = scalar_select %p131_p13, %s1516_s14, %s133_s25  }
  0x29   : > { %s1203_s3 = scalar_select %p1676_p10, %s1536_s19, 0 }
  0x2a   : > { %2099 = sst [smem:[#allocation21_spill]] %s1692_s5  ;;  %s2147_s7 = smov (!%p2077_p12, %s1202_s7), [#allocation13] }
  0x2b   : > { %s2149_s3 = smov (!%p2077_p12, %s1203_s3), 0  ;;  %p958_p1 = scmp.ge.s32.totalorder %s1540_s20, 1 }
  0x2c   : > { %s324_s21 = sld [smem:[%s2147_s7 + %s2149_s3]]  ;;  %p377_p2 = scmp.lt.s32.totalorder %s1540_s20, 4 }
  0x2d   : > { %s2102_s4 = sld [smem:[#allocation25_spill]]  ;;  %s1725_s5 = scalar_lea.sflag [#allocation7], %s319_s29 }
  0x2e   : > { %p1713_p3 = pnand %p958_p1, %p377_p2  ;;  %s1723_s27 = sld [smem:[#allocation3 + %s1536_s19]] }
  0x2f   : > { %p1344_p5 = pneg %p1707_p0 }
  0x30   : > { %s2101_s25 = scalar_select %p1713_p3, 1, 0 }
  0x32   : > { %s969_s26 = sshll.u32 %s324_s21, 11 }
  0x33   : > { %s1720_s12 = scalar_lea.hbm %s2102_s4, %s969_s26  ;;  %s1347_s26 = scalar_lea.hbm %s2102_s4, 6144 }
  0x34   : > { %s1342_s3 = scalar_lea.hbm %s1720_s12, 2048  ;;  %p1348_p10 = scmp.lt.u32.totalorder %s1720_s12, %s2102_s4 }
  0x35   : > { %p1343_p4 = scmp.ne.s32.totalorder %s1720_s12, %s1342_s3  ;;  %p1349_p13 = scmp.lt.u32.totalorder %s1347_s26, %s1342_s3 }
  0x36   : > { %p1351_p2 = scmp.lt.u32.totalorder %s1342_s3, %s1720_s12 }
  0x37   : > { %p1345_p8 = pnand %p1344_p5, %p1343_p4  ;;  %p1350_p1 = por %p1349_p13, %p1348_p10 }
  0x39   : > { %p1346_p9 = pneg %p1345_p8  ;;  %p1352_p12 = por %p1351_p2, %p1350_p1 }
  0x3b   : > { %p1353_p6 = pnand %p1352_p12, %p1346_p9 }
  0x3d   : > { %1356 = shalt.err (!%p1353_p6)
}
  0x3e   : > { %s1357_s29 = scalar_lea.vmem %s1701_s8, 2048  ;;  %s1543_s7 = smov [#allocation6]  }
  0x3f   : > { %p1358_p4 = scmp.ne.s32.totalorder %s1701_s8, %s1357_s29  ;;  %s1362_s21 = sshll.u32 %s1543_s7, 4  ;;  %s1363_s21 = int_to_ptr.vmem [resolvable:$false] %s1362_s21 }
  0x40   : > { %s1364_s30 = scalar_lea.vmem %s1363_s21, 4096  ;;  %p1365_p3 = scmp.lt.s32.totalorder %s1701_s8, %s1363_s21 }
  0x41   : > { %p1360_p8 = pnand %p1358_p4, %p1344_p5  ;;  %p1366_p10 = scmp.lt.s32.totalorder %s1364_s30, %s1357_s29 }
  0x43   : > { %p1361_p11 = pneg %p1360_p8  ;;  %p1367_p13 = por %p1366_p10, %p1365_p3 }
  0x45   : > { %p1368_p1 = pnand %p1367_p13, %p1361_p11 }
  0x47   : > { %1371 = shalt.err (!%p1368_p1)
}
  0x48   : > { %s2080_s3 = smov 128   ;;  %s2082_s26 = smov 8  }
  0x49   : > { %1221 = dma.hbm_to_vmem [thread:$0]  (!%p1707_p0), %s1720_s12, 2048, %s1701_s8, %s1725_s5, %s2080_s3, %s2080_s3, %s2082_s26  }
  0x4a   : > { %s73_s9 = sld [smem:[#allocation3 + %s2145_s22]]  ;;  %p84_p6 = scmp.ne.s32.totalorder %s1528_s17, %s1524_s16 }
  0x4b   : > { %p90_p11 = scmp.ne.s32.totalorder %s1524_s16, %s1520_s15  ;;  %s289_s29 = sand.u32 1, %s1528_s17  }
  0x4c   : > { %s77_s7 = sadd.s32 1, %s1528_s17  ;;  %p2104_p3 = scmp.eq.s32.totalorder %s1540_s20, 0 }
  0x4d   : > { %p1765_p12 = por %p1662_p7, %p90_p11  ;;  %s949_s8 = sshll.u32 %s289_s29, 7 }
  0x4e   : > { %p86_p5 = por %p2104_p3, %p84_p6  ;;  %p2105_p0 = scmp.lt.s32.totalorder %s1540_s20, 3 }
  0x4f   : > { %s2103_s21 = scalar_select %p1765_p12, 1, 0 }
  0x50   : > { %s74_s24 = ssub.s32 %s1723_s27, %s73_s9  ;;  %p1774_p9 = pnand %p2105_p0, %p86_p5 }
  0x51   : > { %p75_p2 = scmp.eq.s32.totalorder %s74_s24, 0  ;;  %s293_s12 = scalar_lea.vmem [#allocation4], %s949_s8 }
  0x52   : > { %s301_s30 = sshll.u32 %s293_s12, 4  ;;  %p2108_p4 = pmov %p2105_p0  ;;  %s1796_s30 = int_to_ptr.vmem [resolvable:$true] %s301_s30 }
  0x53   : > { %s1199_s3 = scalar_select %p86_p5, [#allocation3], [#allocation9] }
  0x54   : > { %s1779_s26 = scalar_select %p75_p2, %s1528_s17, %s77_s7  }
  0x55   : > { %s1200_s4 = scalar_select %p86_p5, %s1536_s19, 0 }
  0x56   : > { %2107 = sst [smem:[#allocation22_spill]] %s1779_s26  ;;  %s2151_s3 = smov (!%p2108_p4, %s1199_s3), [#allocation12] }
  0x57   : > { %p2109_p8 = pmov %p2105_p0  ;;  %s1787_s9 = sld [smem:[#allocation3 + %s1536_s19]] }
  0x58   : > { %s1790_s14 = sld [smem:[#allocation3 + %s2145_s22]]  ;;  %p196_p10 = scmp.ne.s32.totalorder %s1504_s11, %s1500_s0 }
  0x59   : > { %s2153_s4 = smov (!%p2109_p8, %s1200_s4), 0  ;;  %p202_p13 = scmp.ne.s32.totalorder %s1500_s0, %s1496_s10 }
  0x5a   : > { %s294_s27 = sld [smem:[%s2151_s3 + %s2153_s4]]  ;;  %s351_s8 = sand.u32 1, %s1504_s11  }
  0x5b   : > { %p2110_p1 = pmov %p2104_p3  ;;  %s2112_s2 = sld [smem:[#allocation23_spill]] }
  0x5c   : > { %p1812_p11 = por %p202_p13, %p1662_p7  ;;  %s1816_s10 = scalar_lea.sflag [#allocation5], %s289_s29 }
  0x5d   : > { %p1801_p6 = por %p196_p10, %p2110_p1  ;;  %p1374_p5 = pneg %p1774_p9 }
  0x5e   : > { %s2113_s4 = scalar_select %p1812_p11, 1, 0 }
  0x60   : > { %s968_s24 = sshll.u32 %s294_s27, 11 }
  0x61   : > { %s1808_s17 = scalar_lea.hbm %s2112_s2, %s968_s24  ;;  %s1377_s27 = scalar_lea.hbm %s2112_s2, 6144 }
  0x62   : > { %s1372_s3 = scalar_lea.hbm %s1808_s17, 2048  ;;  %p1378_p7 = scmp.lt.u32.totalorder %s1808_s17, %s2112_s2 }
  0x63   : > { %p1373_p3 = scmp.ne.s32.totalorder %s1808_s17, %s1372_s3  ;;  %p1379_p4 = scmp.lt.u32.totalorder %s1377_s27, %s1372_s3 }
  0x64   : > { %p1381_p10 = scmp.lt.u32.totalorder %s1372_s3, %s1808_s17 }
  0x65   : > { %p1375_p0 = pnand %p1374_p5, %p1373_p3  ;;  %p1380_p8 = por %p1379_p4, %p1378_p7 }
  0x67   : > { %p1376_p2 = pneg %p1375_p0  ;;  %p1382_p13 = por %p1381_p10, %p1380_p8 }
  0x69   : > { %p1383_p1 = pnand %p1382_p13, %p1376_p2 }
  0x6b   : > { %1386 = shalt.err (!%p1383_p1)
}
  0x6c   : > { %s1387_s29 = scalar_lea.vmem %s1796_s30, 2048  ;;  %s1546_s26 = smov [#allocation4]  }
  0x6d   : > { %p1388_p3 = scmp.ne.s32.totalorder %s1796_s30, %s1387_s29  ;;  %s1392_s23 = sshll.u32 %s1546_s26, 4  ;;  %s1393_s23 = int_to_ptr.vmem [resolvable:$false] %s1392_s23 }
  0x6e   : > { %s1394_s24 = scalar_lea.vmem %s1393_s23, 4096  ;;  %p1395_p12 = scmp.lt.s32.totalorder %s1796_s30, %s1393_s23 }
  0x6f   : > { %p1390_p0 = pnand %p1388_p3, %p1374_p5  ;;  %p1396_p7 = scmp.lt.s32.totalorder %s1394_s24, %s1387_s29 }
  0x71   : > { %p1391_p11 = pneg %p1390_p0  ;;  %p1397_p4 = por %p1396_p7, %p1395_p12 }
  0x73   : > { %p1398_p8 = pnand %p1397_p4, %p1391_p11 }
  0x75   : > { %1401 = shalt.err (!%p1398_p8)
}
  0x76   : > { %s2114_s3 = smov 8   ;;  %s2115_s27 = smov 128  }
  0x77   : > { %1216 = dma.hbm_to_vmem [thread:$0]  (!%p1774_p9), %s1808_s17, 2048, %s1796_s30, %s1816_s10, %s2115_s27, %s2115_s27, %s2114_s3  }
  0x78   : > { %s186_s15 = ssub.s32 %s1787_s9, %s1790_s14  ;;  %s189_s12 = sadd.s32 1, %s1504_s11 }
  0x79   : > { %p187_p12 = scmp.eq.s32.totalorder %s186_s15, 0  ;;  %s955_s29 = sshll.u32 %s351_s8, 7 }
  0x7a   : > { %s1205_s26 = scalar_select %p1801_p6, [#allocation3], [#allocation11] }
  0x7b   : > { %s1855_s23 = scalar_select %p187_p12, %s1504_s11, %s189_s12  }
  0x7c   : > { %s1206_s24 = scalar_select %p1801_p6, %s1536_s19, 0 }
  0x7d   : > { %p2116_p11 = scmp.lt.s32.totalorder %s1540_s20, 3  ;;  %s353_s17 = scalar_lea.vmem [#allocation8], %s955_s29 }
  0x7e   : > { %s361_s30 = sshll.u32 %s353_s17, 4  ;;  %s1872_s30 = int_to_ptr.vmem [resolvable:$true] %s361_s30 }
  0x7f   : > { %s2155_s26 = smov (!%p2116_p11, %s1205_s26), [#allocation14]  ;;  %p2117_p5 = pmov %p2116_p11 }
  0x81   : > { %s2157_s24 = smov (!%p2117_p5, %s1206_s24), 0  ;;  %p2118_p2 = pmov %p2117_p5 }
  0x82   : > { %s354_s14 = sld [smem:[%s2155_s26 + %s2157_s24]]  ;;  %s1407_s26 = scalar_lea.hbm %s2073_s6, 6144 }
  0x83   : > { %p1868_p10 = pnand %p2118_p2, %p1801_p6 }
  0x85   : > { %p1404_p6 = pneg %p1868_p10 }
  0x88   : > { %s970_s9 = sshll.u32 %s354_s14, 11 }
  0x89   : > { %s1877_s15 = scalar_lea.hbm %s2073_s6, %s970_s9 }
  0x8a   : > { %s1402_s7 = scalar_lea.hbm %s1877_s15, 2048  ;;  %p1408_p3 = scmp.lt.u32.totalorder %s1877_s15, %s2073_s6 }
  0x8b   : > { %p1403_p9 = scmp.ne.s32.totalorder %s1877_s15, %s1402_s7  ;;  %p1409_p0 = scmp.lt.u32.totalorder %s1407_s26, %s1402_s7 }
  0x8c   : > { %p1411_p4 = scmp.lt.u32.totalorder %s1402_s7, %s1877_s15 }
  0x8d   : > { %p1405_p13 = pnand %p1404_p6, %p1403_p9  ;;  %p1410_p7 = por %p1409_p0, %p1408_p3 }
  0x8f   : > { %p1406_p1 = pneg %p1405_p13  ;;  %p1412_p8 = por %p1411_p4, %p1410_p7 }
  0x91   : > { %p1413_p12 = pnand %p1412_p8, %p1406_p1 }
  0x93   : > { %1416 = shalt.err (!%p1413_p12)
}
  0x94   : > { %s1417_s17 = scalar_lea.vmem %s1872_s30, 2048  ;;  %s1547_s9 = smov [#allocation8]  }
  0x95   : > { %p1418_p11 = scmp.ne.s32.totalorder %s1872_s30, %s1417_s17  ;;  %s1422_s8 = sshll.u32 %s1547_s9, 4  ;;  %s1423_s8 = int_to_ptr.vmem [resolvable:$false] %s1422_s8 }
  0x96   : > { %s1424_s10 = scalar_lea.vmem %s1423_s8, 4096  ;;  %p1425_p9 = scmp.lt.s32.totalorder %s1872_s30, %s1423_s8 }
  0x97   : > { %p1420_p5 = pnand %p1418_p11, %p1404_p6  ;;  %p1426_p13 = scmp.lt.s32.totalorder %s1424_s10, %s1417_s17 }
  0x99   : > { %p1421_p2 = pneg %p1420_p5  ;;  %p1427_p3 = por %p1426_p13, %p1425_p9 }
  0x9b   : > { %p1428_p0 = pnand %p1427_p3, %p1421_p2 }
  0x9d   : > { %1431 = shalt.err (!%p1428_p0)
}
  0x9e   : > { %1226 = dma.hbm_to_vmem [thread:$0]  (!%p1868_p10), %s1877_s15, 2048, %s1872_s30, %s1725_s5, %s2115_s27, %s2115_s27, %s2114_s3  }
  0x9f   : > { %p2120_p6 = scmp.ne.s32.totalorder %s2101_s25, 0 }
  0xa0   : > { %s383_s7 = sand.u32 (!%p2120_p6), 1, %s1524_s16   ;;  %p2121_p1 = scmp.ne.s32.totalorder (!%p2120_p6), %s2103_s21, 0 }
  0xa1   : > { %381 = sbr.rel (%p2120_p6) target bundleno = 860 (0x35c), region = 48  ;;  %s959_s12 = sshll.u32 (!%p2120_p6), %s383_s7, 7 }
  0xa2   : > { %s384_s29 = scalar_lea.sflag (!%p2120_p6), [#allocation5], %s383_s7  ;;  %s1911_s26 = scalar_lea.vmem (!%p2120_p6), [#allocation4], %s959_s12 }
  0xa8   : > { %1483 = dma.done.wait (%p2121_p1), %s384_s29, 2048  }
  0xa9   : > { %1485 = vsyncadd (%p2121_p1), %s384_s29, 4294965248  ;;  %s2122_s2 = sadd.s32 4294967295, %s1540_s20   ;;  %s394_s3 = sand.u32 1, %s1512_s13  }
  0xaa   : > { %s392_s5 = sand.u32 1, %s2122_s2   ;;  %s960_s25 = sshll.u32 %s394_s3, 7 }
  0xab   : > { %s393_s27 = scalar_lea.sflag [#allocation7], %s392_s5  ;;  %s1920_s30 = scalar_lea.vmem [#allocation6], %s960_s25 }
  0xac   : > { %p2123_p10 = scmp.ne.s32.totalorder %s2098_s28, 0 }
  0xae   : > { %1487 = dma.done.wait (%p2123_p10), %s393_s27, 2048  }
  0xaf   : > { %1489 = vsyncadd (%p2123_p10), %s393_s27, 4294965248  ;;  %s403_s15 = sand.u32 1, %s1500_s0   ;;  %p2124_p7 = scmp.ne.s32.totalorder %s2113_s4, 0 }
  0xb0   : > { %s961_s21 = sshll.u32 %s403_s15, 7 }
  0xb1   : > { %s1927_s24 = scalar_lea.vmem [#allocation8], %s961_s21 }
  0xb2   : > { %1491 = dma.done.wait (%p2124_p7), %s393_s27, 2048  }
  0xb3   : > { %1493 = vsyncadd (%p2124_p7), %s393_s27, 4294965248  ;;  %v1548_v0 = vmov 0.0|0.0   ;;  %vm1549_vm0 = vmmov 0   ;;  %v1550_v1 = vmov 0.0   ;;  %v494_v2 = vld [vmem:[%s1911_s26] sm:$0xff]  ;;  %v495_v3 = vld [vmem:[%s1911_s26 + $0x8] sm:$0xff] }
  0xb4   : > { %1127 = vmatprep.subr.bf16.mxu0 %v1548_v0  ;;  %1054 = vmatprep.mubr.msk.f32.mxu0 %vm1549_vm0, %v1550_v1  ;;  %v496_v4 = vld [vmem:[%s1911_s26 + $0x10] sm:$0xff]  ;;  %v1128_v5 = vpack.c.bf16 %v495_v3, %v494_v2  ;;  %v497_v6 = vld [vmem:[%s1911_s26 + $0x18] sm:$0xff]  ;;  %v498_v8 = vld [vmem:[%s1911_s26 + $0x20] sm:$0xff]  ;;  %s469_s14 = sld [smem:[#allocation3 + %s1532_s18]]  ;;  %p486_p11 = scmp.lt.s32.totalorder %s1532_s18, 2 }
  0xb5   : > { %1151 = vmatprep.subr.bf16.mxu1 %v1548_v0  ;;  %1089 = vmatprep.mubr.msk.f32.mxu1 %vm1549_vm0, %v1550_v1  ;;  %v1131_v7 = vpack.c.bf16 %v497_v6, %v496_v4  ;;  %v499_v9 = vld [vmem:[%s1911_s26 + $0x28] sm:$0xff]  ;;  %v588_v10 = vld [vmem:[%s1920_s30] sm:$0xff]  ;;  %v590_v12 = vld [vmem:[%s1920_s30 + $0x10] sm:$0xff]  ;;  %s2125_s8 = sld [smem:[#allocation24_spill]]  ;;  %s2127_s27 = sld [smem:[#allocation27_spill]] }
  0xb6   : > { %1129 = vmatpush3.bf16.msra.mxu0 %v1128_v5  ;;  %v589_v11 = vld [vmem:[%s1920_s30 + $0x8] sm:$0xff]  ;;  %v591_v13 = vld [vmem:[%s1920_s30 + $0x18] sm:$0xff]  ;;  %v1134_v14 = vpack.c.bf16 %v499_v9, %v498_v8  ;;  %v500_v16 = vld [vmem:[%s1911_s26 + $0x30] sm:$0xff]  ;;  %s475_s7 = sld [smem:[#allocation3 + %s1532_s18]] }
  0xb7   : > { %1130 = vmatprep.subr.bf16.mxu0 %v1548_v0  ;;  %v1152_v15 = vpack.c.bf16 %v589_v11, %v588_v10  ;;  %v501_v17 = vld [vmem:[%s1911_s26 + $0x38] sm:$0xff]  ;;  %v1155_v18 = vpack.c.bf16 %v591_v13, %v590_v12  ;;  %v592_v19 = vld [vmem:[%s1920_s30 + $0x20] sm:$0xff]  ;;  %v593_v20 = vld [vmem:[%s1920_s30 + $0x28] sm:$0xff]  ;;  %s481_s5 = sld [smem:[#allocation3 + %s1532_s18]]  ;;  %s2165_s18 = smov (!%p486_p11, %s1532_s18), 2 }
  0xb8   : > { %v1137_v21 = vpack.c.bf16 %v501_v17, %v500_v16  ;;  %v502_v22 = vld [vmem:[%s1911_s26 + $0x40] sm:$0xff]  ;;  %v503_v23 = vld [vmem:[%s1911_s26 + $0x48] sm:$0xff]  ;;  %v1158_v24 = vpack.c.bf16 %v593_v20, %v592_v19  ;;  %v594_v25 = vld [vmem:[%s1920_s30 + $0x30] sm:$0xff]  ;;  %s962_s15 = sshll.u32 %s2165_s18, 3  ;;  %s2128_s28 = sld [smem:[#allocation28_spill]] }
  0xb9   : > { %1153 = vmatpush3.bf16.msra.mxu1 %v1152_v15  ;;  %v595_v26 = vld [vmem:[%s1920_s30 + $0x38] sm:$0xff]  ;;  %v1140_v27 = vpack.c.bf16 %v503_v23, %v502_v22  ;;  %v504_v28 = vld [vmem:[%s1911_s26 + $0x50] sm:$0xff]  ;;  %v596_v31 = vld [vmem:[%s1920_s30 + $0x40] sm:$0xff] }
  0xba   : > { %1132 = vmatpush3.bf16.msra.mxu0 %v1131_v7  ;;  %1154 = vmatprep.subr.bf16.mxu1 %v1548_v0  ;;  %v505_v29 = vld [vmem:[%s1911_s26 + $0x58] sm:$0xff]  ;;  %v1161_v30 = vpack.c.bf16 %v595_v26, %v594_v25  ;;  %v597_v32 = vld [vmem:[%s1920_s30 + $0x48] sm:$0xff]  ;;  %v506_v34 = vld [vmem:[%s1911_s26 + $0x60] sm:$0xff]  ;;  %p470_p4 = scmp.lt.s32.totalorder %s469_s14, 2 }
  0xbb   : > { %1133 = vmatprep.subr.bf16.mxu0 %v1548_v0  ;;  %v1143_v33 = vpack.c.bf16 %v505_v29, %v504_v28  ;;  %v507_v35 = vld [vmem:[%s1911_s26 + $0x68] sm:$0xff]  ;;  %v1164_v36 = vpack.c.bf16 %v597_v32, %v596_v31  ;;  %v598_v37 = vld [vmem:[%s1920_s30 + $0x50] sm:$0xff]  ;;  %v599_v38 = vld [vmem:[%s1920_s30 + $0x58] sm:$0xff] }
  0xbc   : > { %v1146_v39 = vpack.c.bf16 %v507_v35, %v506_v34  ;;  %v508_v40 = vld [vmem:[%s1911_s26 + $0x70] sm:$0xff]  ;;  %v509_v41 = vld [vmem:[%s1911_s26 + $0x78] sm:$0xff]  ;;  %v1167_v42 = vpack.c.bf16 %v599_v38, %v598_v37  ;;  %v600_v43 = vld [vmem:[%s1920_s30 + $0x60] sm:$0xff]  ;;  %s2159_s14 = smov (!%p470_p4, %s469_s14), 2  ;;  %p476_p8 = scmp.lt.s32.totalorder %s475_s7, 2 }
  0xbd   : > { %1156 = vmatpush3.bf16.msra.mxu1 %v1155_v18  ;;  %v601_v44 = vld [vmem:[%s1920_s30 + $0x68] sm:$0xff]  ;;  %v1149_v45 = vpack.c.bf16 %v509_v41, %v508_v40  ;;  %v493_v47 = vld [vmem:[%s2068_s1] sm:$0xff]  ;;  %v602_v48 = vld [vmem:[%s1920_s30 + $0x70] sm:$0xff]  ;;  %s472_s10 = scalar_lea.vmem %s2125_s8, %s2159_s14  ;;  %s2126_s26 = sld [smem:[#allocation26_spill]] }
  0xbe   : > { %1135 = vmatpush3.bf16.msra.mxu0 %v1134_v14  ;;  %1157 = vmatprep.subr.bf16.mxu1 %v1548_v0  ;;  %v1170_v46 = vpack.c.bf16 %v601_v44, %v600_v43  ;;  %v603_v49 = vld [vmem:[%s1920_s30 + $0x78] sm:$0xff]  ;;  %v682_v51 = vld [vmem:[%s1927_s24] sm:$0xff]  ;;  %v683_v52 = vld [vmem:[%s1927_s24 + $0x8] sm:$0xff]  ;;  %s2161_s7 = smov (!%p476_p8, %s475_s7), 2  ;;  %p482_p12 = scmp.lt.s32.totalorder %s481_s5, 2 }
  0xbf   : > { %1136 = vmatprep.subr.bf16.mxu0 %v1548_v0  ;;  %v1173_v50 = vpack.c.bf16 %v603_v49, %v602_v48  ;;  %v684_v53 = vld [vmem:[%s1927_s24 + $0x10] sm:$0xff]  ;;  %v1176_v54 = vpack.c.bf16 %v683_v52, %v682_v51  ;;  %v685_v55 = vld [vmem:[%s1927_s24 + $0x18] sm:$0xff]  ;;  %v686_v57 = vld [vmem:[%s1927_s24 + $0x20] sm:$0xff]  ;;  %s492_s4 = scalar_lea.vmem %s2128_s28, %s962_s15 }
  0xc0   : > { %v1179_v56 = vpack.c.bf16 %v685_v55, %v684_v53  ;;  %v687_v58 = vld [vmem:[%s1927_s24 + $0x28] sm:$0xff]  ;;  %v688_v60 = vld [vmem:[%s1927_s24 + $0x30] sm:$0xff]  ;;  %v689_v61 = vld [vmem:[%s1927_s24 + $0x38] sm:$0xff]  ;;  %s2163_s5 = smov (!%p482_p12, %s481_s5), 2 }
  0xc1   : > { %1159 = vmatpush3.bf16.msra.mxu1 %v1158_v24  ;;  %v1182_v59 = vpack.c.bf16 %v687_v58, %v686_v57  ;;  %v1185_v62 = vpack.c.bf16 %v689_v61, %v688_v60  ;;  %v690_v63 = vld [vmem:[%s1927_s24 + $0x40] sm:$0xff]  ;;  %v692_v3 = vld [vmem:[%s1927_s24 + $0x50] sm:$0xff]  ;;  %v693_v4 = vld [vmem:[%s1927_s24 + $0x58] sm:$0xff]  ;;  %s484_s30 = scalar_lea.vmem %s2127_s27, %s2163_s5 }
  0xc2   : > { %1138 = vmatpush3.bf16.msra.mxu0 %v1137_v21  ;;  %1160 = vmatprep.subr.bf16.mxu1 %v1548_v0  ;;  %v1191_v5 = vpack.c.bf16 %v693_v4, %v692_v3  ;;  %v694_v6 = vld [vmem:[%s1927_s24 + $0x60] sm:$0xff]  ;;  %v695_v7 = vld [vmem:[%s1927_s24 + $0x68] sm:$0xff]  ;;  %v696_v14 = vld [vmem:[%s1927_s24 + $0x70] sm:$0xff] }
  0xc3   : > { %1139 = vmatprep.subr.bf16.mxu0 %v1548_v0  ;;  %v1194_v8 = vpack.c.bf16 %v695_v7, %v694_v6  ;;  %v963_v9 = vld [vmem:[%s472_s10] ss:$0 sm:$0xff]  ;;  %v697_v15 = vld [vmem:[%s1927_s24 + $0x78] sm:$0xff]  ;;  %s478_s2 = scalar_lea.vmem %s2126_s26, %s2161_s7 }
  0xc4   : > { %v1197_v16 = vpack.c.bf16 %v697_v15, %v696_v14  ;;  %v965_v21 = vld [vmem:[%s484_s30] ss:$0 sm:$0xff] }
  0xc5   : > { %1162 = vmatpush3.bf16.msra.mxu1 %v1161_v30 }
  0xc6   : > { %1141 = vmatpush3.bf16.msra.mxu0 %v1140_v27  ;;  %1163 = vmatprep.subr.bf16.mxu1 %v1548_v0 }
  0xc7   : > { %1142 = vmatprep.subr.bf16.mxu0 %v1548_v0 }
  0xc9   : > { %1165 = vmatpush3.bf16.msra.mxu1 %v1164_v36 }
  0xca   : > { %1144 = vmatpush3.bf16.msra.mxu0 %v1143_v33  ;;  %1166 = vmatprep.subr.bf16.mxu1 %v1548_v0 }
  0xcb   : > { %1145 = vmatprep.subr.bf16.mxu0 %v1548_v0 }
  0xcd   : > { %1168 = vmatpush3.bf16.msra.mxu1 %v1167_v42 }
  0xce   : > { %1147 = vmatpush3.bf16.msra.mxu0 %v1146_v39  ;;  %1169 = vmatprep.subr.bf16.mxu1 %v1548_v0 }
  0xcf   : > { %1148 = vmatprep.subr.bf16.mxu0 %v1548_v0 }
  0xd1   : > { %1171 = vmatpush3.bf16.msra.mxu1 %v1170_v46 }
  0xd2   : > { %1150 = vmatpush3.bf16.msra.mxu0 %v1149_v45  ;;  %1172 = vmatprep.subr.bf16.mxu1 %v1548_v0 }
  0xd3   : > { %1175 = vmatprep.subr.bf16.mxu0 %v1548_v0 }
  0xd5   : > { %1055 = vmatmul.mubr.f32.vlgmr.msra.gmra.mrb[0].mxu0 %v493_v47  ;;  %1174 = vmatpush3.bf16.msra.mxu1 %v1173_v50 }
  0xd6   : > { %1124 = vmatprep.mubr.msk.f32.mxu0 %vm1549_vm0, %v1550_v1  ;;  %1177 = vmatpush3.bf16.msra.mxu0 %v1176_v54  ;;  %v691_v1 = vld [vmem:[%s1927_s24 + $0x48] sm:$0xff] }
  0xd7   : > { %1178 = vmatprep.subr.bf16.mxu0 %v1548_v0  ;;  %v1188_v2 = vpack.c.bf16 %v691_v1, %v690_v63 }
  0xda   : > { %1180 = vmatpush3.bf16.msra.mxu0 %v1179_v56 }
  0xdb   : > { %1181 = vmatprep.subr.bf16.mxu0 %v1548_v0 }
  0xde   : > { %1183 = vmatpush3.bf16.msra.mxu0 %v1182_v59 }
  0xdf   : > { %1184 = vmatprep.subr.bf16.mxu0 %v1548_v0 }
  0xe2   : > { %1186 = vmatpush3.bf16.msra.mxu0 %v1185_v62 }
  0xe3   : > { %1187 = vmatprep.subr.bf16.mxu0 %v1548_v0 }
  0xe6   : > { %1189 = vmatpush3.bf16.msra.mxu0 %v1188_v2 }
  0xe7   : > { %1190 = vmatprep.subr.bf16.mxu0 %v1548_v0 }
  0xea   : > { %1192 = vmatpush3.bf16.msra.mxu0 %v1191_v5 }
  0xeb   : > { %1193 = vmatprep.subr.bf16.mxu0 %v1548_v0 }
  0xee   : > { %1195 = vmatpush3.bf16.msra.mxu0 %v1194_v8 }
  0xef   : > { %1196 = vmatprep.subr.bf16.mxu0 %v1548_v0  ;;  %v964_v0 = vld [vmem:[%s478_s2] ss:$0 sm:$0xff] }
  0xf2   : > { %1198 = vmatpush3.bf16.msra.mxu0 %v1197_v16 }
 0x1a8   : > { %v583_v10 = vpop.f32.mrb[0].mxu0 }
 0x1a9   : > { %v584_v11 = vadd.f32 %v963_v9, %v583_v10  ;;  %v1056_v12 = vpop.f32.mrb[1].mxu0 }
 0x1ab   : > { %v587_v13 = vmax.f32 %v584_v11, 0.0 }
 0x1ad   : > { %1090 = vmatmul.mubr.f32.vlgmr.msra.gmra.mrb[0].mxu1 %v587_v13 }
 0x280   : > { %v677_v17 = vpop.f32.mrb[0].mxu1 }
 0x281   : > { %v678_v18 = vadd.f32 %v964_v0, %v677_v17  ;;  %v1091_v19 = vpop.f32.mrb[1].mxu1 }
 0x283   : > { %v681_v20 = vmax.f32 %v678_v18, 0.0 }
 0x285   : > { %1125 = vmatmul.mubr.f32.vlgmr.msra.gmra.mrb[2].mxu0 %v681_v20 }
 0x358   : > { %v771_v22 = vpop.f32.mrb[2].mxu0 }
 0x359   : > { %v772_v23 = vadd.f32 %v965_v21, %v771_v22  ;;  %v1126_v24 = vpop.f32.mrb[3].mxu0 }
 0x35b   : > { %775 = vst [vmem:[%s492_s4] sm:$0xff] %v772_v23 }
 0x35c PF: > { %s30_s20 = sadd.s32 1, %s1540_s20   ;;  %s2129_s14 = sld [smem:[#allocation19_spill]] }
 0x35d   : > { %p27_p5 = scmp.ge.s32.totalorder %s30_s20, 5   ;;  %s2130_s17 = sld [smem:[#allocation21_spill]] }
 0x35e   : > { %s2131_s18 = sld [smem:[#allocation20_spill]]  ;;  %s2132_s9 = sld [smem:[#allocation22_spill]] }
 0x35f   : > { %s2133_s10 = smov %s1500_s0  ;;  %s2134_s0 = smov %s1504_s11 }
 0x360   : > { %s2135_s11 = smov %s1855_s23  ;;  %s2136_s12 = smov %s1512_s13 }
 0x361   : > { %s2139_s15 = smov %s1524_s16  ;;  %29 = sbr.rel (!%p27_p5) target bundleno = 26 (0x1a), region = 124 }
 0x362   : > { %s2137_s13 = smov %s2129_s14 }
 0x363   : > { %s2138_s14 = smov %s2130_s17 }
 0x364   : > { %s2140_s16 = smov %s2131_s18  ;;  %s2141_s17 = smov %s2132_s9 }
 0x365   : > { %s2142_s18 = smov %s1536_s19  ;;  %s2143_s19 = smov %s2145_s22 }
 0x368   :  { %801 = vsyncpa [#allocation5], 1 }
 0x369   :  { %803 = vsyncpa [#allocation5 + $0x1], 1 }
 0x36a   :  { %804 = vsyncpa [#allocation7], 1 }
 0x36b   :  { %806 = vsyncpa [#allocation7 + $0x1], 1 }

</bundles_post_ra>
